<compile_context>
chip_gen: v7x
topology: tpu7x:2x2x1
jax: 0.10.0
libtpu: 0.0.40
codegen_flags: <defaults>
</compile_context>

<pallas_src>
import functools

import jax
import jax.numpy as jnp
from jax.experimental import pallas as pl
from jax.experimental.pallas import tpu as pltpu


def _rmsnorm_kernel(x_ref, w_ref, o_ref, *, eps, h_true):
    # x_ref: (TM, Hp) tile of rows; w_ref: (1, Hp) fp32 weight; o_ref: (TM, Hp).
    x = x_ref[...]
    xf = x.astype(jnp.float32)
    # Sum over the (possibly zero-padded) lane axis, divide by the TRUE hidden
    # size: zero-padded columns contribute 0 to the sum, so the mean matches
    # the unpadded PyTorch computation exactly.
    variance = jnp.sum(xf * xf, axis=-1, keepdims=True) / h_true
    inv = jax.lax.rsqrt(variance + eps)                 # EUP; off the mem-bound path
    # PyTorch: weight(fp32) * (x * rsqrt(var + eps)).to(input_dtype)
    normed = (xf * inv).astype(x.dtype)                 # exact .to(input_dtype) round-trip
    out = w_ref[...] * normed.astype(jnp.float32)       # weight already fp32
    o_ref[...] = out.astype(o_ref.dtype)


def rms_norm(x, weight, eps=1e-6, *, block_rows=512, out_dtype=None,
             min_grid_steps=4):
    """x: (..., H), weight: (H,). Matches PyTorch RMSNorm.forward semantics.

    out_dtype defaults to x.dtype (cuts output HBM traffic for bf16
    activations). Pass out_dtype=jnp.promote_types(weight.dtype, x.dtype) to
    reproduce PyTorch's fp32-promoted output dtype bit-for-bit.
    """
    orig_shape = x.shape
    H = orig_shape[-1]
    rows = 1
    for d in orig_shape[:-1]:
        rows *= d

    if out_dtype is None:
        out_dtype = x.dtype

    # --- Lane-density guard: pad hidden axis to a multiple of 128. ----------
    Hp = ((H + 127) // 128) * 128
    x2 = x.reshape(rows, H)
    w_f32 = weight.astype(jnp.float32).reshape(1, H)
    if Hp != H:
        x2 = jnp.pad(x2, ((0, 0), (0, Hp - H)))
        w_f32 = jnp.pad(w_f32, ((0, 0), (0, Hp - H)))

    in_bytes = jnp.dtype(x2.dtype).itemsize
    out_bytes = jnp.dtype(out_dtype).itemsize

    # --- Generation-aware VMEM budgets. --------------------------------------
    try:
        vmem_cap = int(pltpu.get_tpu_info().vmem_capacity_bytes)
    except Exception:
        vmem_cap = 64 * 1024 * 1024  # conservative (v7x-sized) fallback
    if vmem_cap >= 100 * 1024 * 1024:          # v5e / v6e: 128 MiB physical
        vmem_tile_budget = 48 * 1024 * 1024
        vmem_limit_cap = 64 * 1024 * 1024
    else:                                      # v7x: 64 MiB per TensorCore
        vmem_tile_budget = 20 * 1024 * 1024
        vmem_limit_cap = 44 * 1024 * 1024

    # --- Row tile: amortize per-step overhead, but keep >= min_grid_steps so
    # both v7x TensorCores get work and the pipeline has something to overlap.
    if rows <= 8:
        bm = rows
    else:
        step_cap = max(8, ((rows // min_grid_steps) // 8) * 8)
        bm = min(max(8, (block_rows // 8) * 8), step_cap, rows)

    def _tile_bytes(m):
        # 2x double-buffered input tile + 2x double-buffered output tile
        # + ~2 fp32 intermediates (f32 copy of the tile + f32 product)
        # + resident fp32 weight row.
        return (2 * m * Hp * (in_bytes + out_bytes)
                + 2 * m * Hp * 4
                + Hp * 4)

    while bm > 8 and _tile_bytes(bm) > vmem_tile_budget:
        bm = max(8, ((bm // 2) // 8) * 8)

    grid = (pl.cdiv(rows, bm),)

    vmem_limit = int(_tile_bytes(bm) * 1.25) + (2 << 20)
    vmem_limit = max(vmem_limit, 16 * 1024 * 1024)
    vmem_limit = min(vmem_limit, vmem_limit_cap)

    kernel = functools.partial(_rmsnorm_kernel, eps=eps, h_true=float(H))

    out = pl.pallas_call(
        kernel,
        out_shape=jax.ShapeDtypeStruct((rows, Hp), out_dtype),
        grid_spec=pltpu.PrefetchScalarGridSpec(
            num_scalar_prefetch=0,
            grid=grid,
            in_specs=[
                pl.BlockSpec((bm, Hp), lambda i: (i, 0)),
                pl.BlockSpec((1, Hp), lambda i: (0, 0)),   # weight stays resident
            ],
            out_specs=pl.BlockSpec((bm, Hp), lambda i: (i, 0)),
        ),
        compiler_params=pltpu.CompilerParams(
            dimension_semantics=("parallel",),
            vmem_limit_bytes=vmem_limit,
        ),
    )(x2, w_f32)

    if Hp != H:
        out = out[:, :H]
    return out.reshape(orig_shape)


def rms_norm_ref(x, weight, eps=1e-6):
    input_dtype = x.dtype
    xf = x.astype(jnp.float32)
    variance = jnp.mean(xf * xf, axis=-1, keepdims=True)
    normed = (xf * jax.lax.rsqrt(variance + eps)).astype(input_dtype)
    return weight * normed


if __name__ == "__main__":
    key = jax.random.PRNGKey(0)
    batch, seq, hidden = 2, 8, 32

    x = jax.random.normal(key, (batch, seq, hidden), dtype=jnp.float32)
    # nn.Parameter(torch.ones(hidden_size)) -> deterministic ones, fp32.
    weight = jnp.ones((hidden,), dtype=jnp.float32)

    out = rms_norm(x, weight, eps=1e-6)
    out = jax.block_until_ready(out)

    ref = rms_norm_ref(x, weight, eps=1e-6)
    assert out.shape == x.shape, (out.shape, x.shape)
    assert out.dtype == x.dtype, (out.dtype, x.dtype)
    assert jnp.allclose(out.astype(jnp.float32), ref, atol=1e-5, rtol=1e-5), float(
        jnp.max(jnp.abs(out.astype(jnp.float32) - ref))
    )
    print("KERNEL_OK")
</pallas_src>

<mosaic_0001>
module attributes {stable_mosaic.version = 11 : i64} {
  func.func @_rmsnorm_kernel(%arg0: i32, %arg1: memref<8x128xf32, #tpu.memory_space<vmem>>, %arg2: memref<1x128xf32, #tpu.memory_space<vmem>>, %arg3: memref<8x128xf32, #tpu.memory_space<vmem>>) attributes {dimension_semantics = [#tpu.dimension_semantics<parallel>], iteration_bounds = array<i64: 2>, scalar_prefetch = 0 : i64, scratch_operands = 0 : i64, tpu.core_type = #tpu.core_type<tc>, window_params = [{transform_indices = @transform_0, window_bounds = array<i64: 8, 128>}, {pipeline_mode = #tpu.pipeline_mode<synchronous>, transform_indices = @transform_1, window_bounds = array<i64: 1, 128>}, {transform_indices = @transform_2, window_bounds = array<i64: 8, 128>}]} {
    %c0 = arith.constant 0 : index
    %c0_0 = arith.constant 0 : index
    %0 = vector.load %arg1[%c0, %c0_0] : memref<8x128xf32, #tpu.memory_space<vmem>>, vector<8x128xf32>
    %1 = arith.mulf %0, %0 : vector<8x128xf32>
    %cst = arith.constant dense<0.000000e+00> : vector<8xf32>
    %2 = vector.multi_reduction <add>, %1, %cst [1] : vector<8x128xf32> to vector<8xf32>
    %3 = vector.shape_cast %2 : vector<8xf32> to vector<8x1xf32>
    %cst_1 = arith.constant 3.200000e+01 : f32
    %4 = vector.broadcast %cst_1 : f32 to vector<8x1xf32>
    %5 = arith.divf %3, %4 : vector<8x1xf32>
    %cst_2 = arith.constant 9.99999997E-7 : f32
    %6 = vector.broadcast %cst_2 : f32 to vector<8x1xf32>
    %7 = arith.addf %5, %6 : vector<8x1xf32>
    %8 = math.rsqrt %7 : vector<8x1xf32>
    %9 = vector.broadcast %8 : vector<8x1xf32> to vector<8x128xf32>
    %10 = arith.mulf %0, %9 : vector<8x128xf32>
    %c0_3 = arith.constant 0 : index
    %c0_4 = arith.constant 0 : index
    %11 = vector.load %arg2[%c0_3, %c0_4] : memref<1x128xf32, #tpu.memory_space<vmem>>, vector<1x128xf32>
    %12 = vector.broadcast %11 : vector<1x128xf32> to vector<8x128xf32>
    %13 = arith.mulf %12, %10 : vector<8x128xf32>
    %c0_5 = arith.constant 0 : index
    %c0_6 = arith.constant 0 : index
    %14 = vector.load %arg3[%c0_5, %c0_6] : memref<8x128xf32, #tpu.memory_space<vmem>>, vector<8x128xf32>
    tpu.vector_store %arg3[%c0_5, %c0_6], %13 {strides = array<i32>} : memref<8x128xf32, #tpu.memory_space<vmem>>, vector<8x128xf32>,
    return
  }
  func.func @transform_0(%arg0: i32) -> (i32, i32) {
    %c0_i32 = arith.constant 0 : i32
    %c0_i32_0 = arith.constant 0 : i32
    return %arg0, %c0_i32 : i32, i32
  }
  func.func @transform_1(%arg0: i32) -> (i32, i32) {
    %c0_i32 = arith.constant 0 : i32
    %c0_i32_0 = arith.constant 0 : i32
    %c0_i32_1 = arith.constant 0 : i32
    return %c0_i32, %c0_i32_0 : i32, i32
  }
  func.func @transform_2(%arg0: i32) -> (i32, i32) {
    %c0_i32 = arith.constant 0 : i32
    %c0_i32_0 = arith.constant 0 : i32
    return %arg0, %c0_i32 : i32, i32
  }
}

</mosaic_0001>

<bundles_post_ra>
// kernel: tpu_custom_call.1
= control target key start
LH: loop header
LB: loop body
LE: loop exit
PB: predicated region body
PF: predicated region fallthrough
CT: control target
= control target key end

     0   :  { %7 = vsyncpa [#allocation3], 0  ;;  %s601_s0 = inlined_call_operand.hbm [shape: f32[16,128], index: 0, kind: input, shape index: {}]   ;;  %s602_s1 = inlined_call_operand.vmem [shape: f32[1,128], index: 1, kind: input, shape index: {}]   ;;  %s603_s2 = inlined_call_operand.hbm [shape: f32[16,128], index: 2, kind: output, shape index: {}]  }
   0x1   :  { %9 = vsyncpa [#allocation3 + $0x1], 0 }
   0x2   :  { %10 = vsyncpa [#allocation4], 0 }
   0x3   :  { %12 = vsyncpa [#allocation4 + $0x1], 0  ;;  %s437_s9 = smov 0   ;;  %s439_s10 = smov 0  }
   0x4   :  { %s441_s11 = smov 0   ;;  %s443_s12 = smov 0  }
   0x5 LB: > { %s458_s13 = sadd.s32 4294967295, %s418_s12   ;;  %s261_s14 = sadd.s32 4294967294, %s418_s12   ;;  %s418_s12 = sphi %s443_s12, %s618_s12   ;;  %s414_s11 = sphi %s441_s11, %s617_s11   ;;  %s410_s10 = sphi %s439_s10, %s616_s10   ;;  %s406_s9 = sphi %s437_s9, %s615_s9  }
   0x6   : > { %s462_s15 = sadd.s32 1, %s418_s12   ;;  %s25_s16 = sadd.s32 1, %s414_s11 }
   0x7   : > { %s22_s17 = ssub.s32 %s418_s12, %s462_s15  ;;  %p32_p0 = scmp.ne.s32.totalorder %s414_s11, %s410_s10 }
   0x8   : > { %p23_p1 = scmp.eq.s32.totalorder %s22_s17, 0  ;;  %p33_p2 = scmp.eq.s32.totalorder %s418_s12, 0 }
   0x9   : > { %p38_p3 = scmp.ne.s32.totalorder %s410_s10, %s406_s9  ;;  %p39_p4 = scmp.eq.s32.totalorder %s458_s13, 0 }
   0xa   : > { %s474_s18 = scalar_select %p23_p1, %s414_s11, %s25_s16  }
   0xb   : > { %p476_p5 = por %p33_p2, %p32_p0  ;;  %p480_p6 = por %p39_p4, %p38_p3 }
   0xc   : > { %p83_p7 = scmp.eq.s32.totalorder %s458_s13, 1  ;;  %p89_p8 = scmp.eq.s32.totalorder %s261_s14, 1 }
   0xd   : > { %p286_p10 = scmp.lt.s32.totalorder %s418_s12, 2  ;;  %s112_s23 = sand.u32 1, %s414_s11  }
   0xe   : > { %p487_p11 = por %p83_p7, %p32_p0  ;;  %p491_p12 = por %p89_p8, %p38_p3 }
   0xf   : > { %s265_s24 = sshll.u32 %s418_s12, 7  ;;  %s264_s25 = sshll.u32 %s112_s23, 3 }
  0x10   : > { %s607_s21 = scalar_select %p487_p11, 1, 0 }
  0x11   : > { %s608_s22 = scalar_select %p491_p12, 1, 0 }
  0x12   : > { %s500_s28 = scalar_lea.hbm %s601_s0, %s265_s24  ;;  %s116_s29 = scalar_lea.vmem [#allocation2], %s264_s25 }
  0x13   : > { %s123_s30 = sshll.u32 %s116_s29, 4  ;;  %p504_p13 = pnand %p286_p10, %p476_p5  ;;  %s508_s30 = int_to_ptr.vmem [resolvable:$true] %s123_s30 }
  0x14   : > { %s113_s4 = scalar_lea.sflag [#allocation3], %s112_s23  ;;  %s322_s5 = scalar_lea.hbm %s500_s28, 128 }
  0x15   : > { %p323_p2 = scmp.ne.s32.totalorder %s500_s28, %s322_s5  ;;  %p324_p3 = pneg %p504_p13 }
  0x16   : > { %s327_s8 = scalar_lea.hbm %s601_s0, 256  ;;  %p328_p5 = scmp.lt.u32.totalorder %s500_s28, %s601_s0 }
  0x17   : > { %p325_p4 = pnand %p324_p3, %p323_p2  ;;  %p329_p8 = scmp.lt.u32.totalorder %s327_s8, %s322_s5 }
  0x18   : > { %p331_p9 = scmp.lt.u32.totalorder %s322_s5, %s500_s28 }
  0x19   : > { %p326_p7 = pneg %p325_p4  ;;  %p330_p10 = por %p329_p8, %p328_p5 }
  0x1b   : > { %p332_p0 = por %p331_p9, %p330_p10 }
  0x1d   : > { %p333_p1 = pnand %p332_p0, %p326_p7 }
  0x1f   : > { %336 = shalt.err (!%p333_p1)
}
  0x20   : > { %s337_s17 = scalar_lea.vmem %s508_s30, 128  ;;  %s420_s19 = smov [#allocation2]  }
  0x21   : > { %p338_p2 = scmp.ne.s32.totalorder %s508_s30, %s337_s17  ;;  %s342_s23 = sshll.u32 %s420_s19, 4  ;;  %s343_s23 = int_to_ptr.vmem [resolvable:$false] %s342_s23 }
  0x22   : > { %s344_s24 = scalar_lea.vmem %s343_s23, 256  ;;  %p345_p11 = scmp.lt.s32.totalorder %s508_s30, %s343_s23 }
  0x23   : > { %p340_p4 = pnand %p338_p2, %p324_p3  ;;  %p346_p5 = scmp.lt.s32.totalorder %s344_s24, %s337_s17 }
  0x25   : > { %p341_p12 = pneg %p340_p4  ;;  %p347_p8 = por %p346_p5, %p345_p11 }
  0x27   : > { %p348_p9 = pnand %p347_p8, %p341_p12 }
  0x29   : > { %351 = shalt.err (!%p348_p9)
}
  0x2a   : > { %281 = dma.hbm_to_vmem [thread:$0]  (!%p504_p13), %s500_s28, 128, %s508_s30, %s113_s4  }
  0x2b   : > { %p610_p0 = scmp.lt.s32.totalorder %s418_s12, 3  ;;  %p611_p1 = scmp.ge.s32.totalorder %s418_s12, 1 }
  0x2d   : > { %p129_p3 = pnand %p611_p1, %p610_p0 }
  0x2e   : > { %s542_s25 = sand.u32 (!%p129_p3), 1, %s410_s10  }
  0x2f   : > { %132 = sbr.rel (%p129_p3) target bundleno = 233 (0xe9), region = 28  ;;  %s267_s26 = sshll.u32 (!%p129_p3), %s542_s25, 3 }
  0x30   : > { %s135_s27 = scalar_lea.sflag (!%p129_p3), [#allocation3], %s542_s25  ;;  %s138_s29 = scalar_lea.vmem (!%p129_p3), [#allocation2], %s267_s26 }
  0x36   : > { %397 = dma.done.wait (%p480_p6), %s135_s27, 128  }
  0x37   : > { %399 = vsyncadd (%p480_p6), %s135_s27, 4294967168  ;;  %v159_v0 = vld [vmem:[%s138_s29] sm:$0xff]  ;;  %s271_s3 = sshll.u32 %s458_s13, 7  ;;  %s158_s4 = scalar_lea.vmem [#allocation5], %s267_s26 }
  0x38   : > { %v160_v1 = vmul.f32 %v159_v0, %v159_v0  ;;  %v269_v6 = vld [vmem:[%s602_s1] ss:$0 sm:$0xff]  ;;  %s191_s5 = sshll.u32 %s158_s4, 4  ;;  %s557_s7 = scalar_lea.hbm %s603_s2, %s271_s3  ;;  %s559_s5 = int_to_ptr.vmem [resolvable:$true] %s191_s5 }
  0x39   : > { %s178_s8 = scalar_lea.sflag [#allocation4], %s542_s25  ;;  %s352_s14 = scalar_lea.vmem %s559_s5, 128 }
  0x3a   : > { %161 = vadd.xlane.f32.xlu0 %v160_v1  ;;  %p353_p6 = scmp.ne.s32.totalorder %s559_s5, %s352_s14  ;;  %p612_p11 = scmp.ne.s32.totalorder %s607_s21, 0 }
  0x3b   : > { %s421_s13 = smov [#allocation5]  }
  0x3c   : > { %p354_p12 = pnand %p353_p6, %p612_p11  ;;  %s356_s16 = sshll.u32 %s421_s13, 4  ;;  %s357_s16 = int_to_ptr.vmem [resolvable:$false] %s356_s16 }
  0x3d   : > { %s358_s17 = scalar_lea.vmem %s357_s16, 256  ;;  %p359_p7 = scmp.lt.s32.totalorder %s559_s5, %s357_s16 }
  0x3e   : > { %p355_p13 = pneg %p354_p12  ;;  %p360_p10 = scmp.lt.s32.totalorder %s358_s17, %s352_s14 }
  0x40   : > { %p361_p2 = por %p360_p10, %p359_p7 }
  0x42   : > { %p362_p4 = pnand %p361_p2, %p355_p13 }
  0xc7   : > { %v162_v2 = vpop.xlane.xlu0 %161 }
  0xc8   : > { %v164_v3 = vmul.f32 0.03125, %v162_v2 }
  0xca   : > { %v165_v4 = vadd.f32 1e-06, %v164_v3 }
  0xcc   : > { %320 = vrsqrt.f32 %v165_v4 }
  0xd6   : > { %v321_v5 = vpop.eup %320 }
  0xd7   : > { %v167_v7 = vmul.f32 %v321_v5, %v159_v0 }
  0xd9   : > { %v175_v8 = vmul.f32 %v269_v6, %v167_v7 }
  0xdb   : > { %176 = vst [vmem:[%s158_s4] sm:$0xff] %v175_v8 }
  0xdc   : > { %365 = shalt.err (!%p362_p4)
}
  0xdd   : > { %s366_s19 = scalar_lea.hbm %s557_s7, 128  ;;  %s370_s25 = scalar_lea.hbm %s603_s2, 256 }
  0xde   : > { %p367_p5 = scmp.ne.s32.totalorder %s557_s7, %s366_s19  ;;  %p371_p0 = scmp.lt.u32.totalorder %s557_s7, %s603_s2 }
  0xdf   : > { %p372_p1 = scmp.lt.u32.totalorder %s370_s25, %s366_s19  ;;  %p374_p6 = scmp.lt.u32.totalorder %s366_s19, %s557_s7 }
  0xe0   : > { %p368_p8 = pnand %p367_p5, %p612_p11 }
  0xe1   : > { %p373_p3 = por %p372_p1, %p371_p0 }
  0xe2   : > { %p369_p9 = pneg %p368_p8 }
  0xe3   : > { %p375_p12 = por %p374_p6, %p373_p3 }
  0xe5   : > { %p376_p13 = pnand %p375_p12, %p369_p9 }
  0xe7   : > { %379 = shalt.err (!%p376_p13)
}
  0xe8   : > { %276 = dma.vmem_to_hbm [thread:$0]  (%p612_p11), %s559_s5, 128, %s557_s7, %s178_s8  }
  0xe9 PF: > { %s203_s29 = sand.u32 1, %s406_s9   ;;  %p613_p7 = scmp.ne.s32.totalorder %s608_s22, 0 }
  0xea   : > { %p614_p10 = scmp.ge.s32.totalorder %s418_s12, 2  ;;  %s204_s28 = scalar_lea.sflag [#allocation4], %s203_s29 }
  0xec   : > { %p283_p2 = pnand %p614_p10, %p613_p7 }
  0xee   : > { %401 = dma.done.wait (!%p283_p2), %s204_s28, 128  }
  0xef   : > { %403 = vsyncadd (!%p283_p2), %s204_s28, 4294967168  ;;  %p15_p4 = scmp.ge.s32.totalorder %s462_s15, 4   ;;  %s615_s9 = smov %s410_s10 }
  0xf0   : > { %s616_s10 = smov %s414_s11  ;;  %s617_s11 = smov %s474_s18 }
  0xf1   : > { %s618_s12 = smov %s462_s15  ;;  %17 = sbr.rel (!%p15_p4) target bundleno = 5 (0x5), region = 73 }
  0xf8   :  { %209 = vsyncpa [#allocation3], 1 }
  0xf9   :  { %211 = vsyncpa [#allocation3 + $0x1], 1 }
  0xfa   :  { %212 = vsyncpa [#allocation4], 1 }
  0xfb   :  { %214 = vsyncpa [#allocation4 + $0x1], 1 }

</bundles_post_ra>
